<compile_context>
chip_gen: v7x
topology: tpu7x:2x2x1
jax: 0.10.0
libtpu: 0.0.40
codegen_flags: <defaults>
</compile_context>

<pallas_src>
import jax
import jax.numpy as jnp
from jax import lax
from jax.experimental import pallas as pl
from jax.experimental.pallas import tpu as pltpu


# --------------------------------------------------------------------------
# Fused 3x3 conv kernel (stride 1, 'SAME' padding), bias included.
#   x_ref: (1, M, K)    bf16 im2col tile (K = 9 * Cin), M = tile_h * W
#   w_ref: (K, Cout)    bf16 weight matrix (VMEM-resident)
#   b_ref: (1, Cout)    f32 bias          (VMEM-resident)
#   o_ref: (1, M, Cout) lane-dense f32 output tile
# --------------------------------------------------------------------------
def _conv3x3_kernel(x_ref, w_ref, b_ref, o_ref):
    acc = jnp.dot(x_ref[0, :, :], w_ref[...],
                  preferred_element_type=jnp.float32)
    o_ref[0, :, :] = (acc + b_ref[...]).astype(o_ref.dtype)


def _choose_tiling(H, W, *, sublane_align=16, target_rows=4096):
    """Pick (tile_h, padded_H).

    Prefers a divisor of H with (tile_h * W) sublane-aligned (16 for the bf16
    input block) so no post-kernel slice / HBM copy is needed; otherwise pads
    H up to a multiple of an aligned tile and slices afterwards (rare).
    """
    divisors = [t for t in range(1, H + 1)
                if H % t == 0 and (t == H or (t * W) % sublane_align == 0)]
    good = [t for t in divisors if t * W <= max(target_rows, W)]
    if good:
        return max(good), H
    t = max(1, target_rows // W)
    while (t * W) % sublane_align:
        t += 1
    return t, pl.cdiv(H, t) * t


# --------------------------------------------------------------------------
# Wrapper: ConvTokenizer.forward
# --------------------------------------------------------------------------
def conv_tokenizer_forward(x_nchw, w_hwio, b):
    """x_nchw: (B, Cin, H, W); w_hwio: (3, 3, Cin, Cout); b: (Cout,).
    Returns NHWC output (B, H, W, Cout)."""
    B, Cin, H, W = x_nchw.shape
    KH, KW, _, Cout = w_hwio.shape
    assert (KH, KW) == (3, 3)
    K = KH * KW * Cin

    # ---- wrapper-side im2col (cheap vs. the 512 B/pixel output writeback) --
    x = jnp.transpose(x_nchw, (0, 2, 3, 1))                   # (B, H, W, Cin)
    xp = jnp.pad(x, ((0, 0), (1, 1), (1, 1), (0, 0)))         # 'SAME' pad
    cols = jnp.concatenate(
        [xp[:, ky:ky + H, kx:kx + W, :] for ky in range(KH) for kx in range(KW)],
        axis=-1)                                               # (B, H, W, K)

    tile_h, Hp = _choose_tiling(H, W)
    x_flat = cols.reshape(B, H * W, K)
    if Hp != H:                                                # rare fallback
        x_flat = jnp.pad(x_flat, ((0, 0), (0, (Hp - H) * W), (0, 0)))
    x_flat = x_flat.astype(jnp.bfloat16)                       # 1-pass MXU inputs
    w_mat = w_hwio.reshape(K, Cout).astype(jnp.bfloat16)
    b_row = b.reshape(1, Cout).astype(jnp.float32)

    m = tile_h * W
    nrt = Hp // tile_h
    # double-buffered working set: input lanes pad K -> 128 in VMEM
    vmem_need = 2 * (m * 128 * 2 + m * max(Cout, 128) * 4) + (2 << 20)
    vmem_limit = int(min(max(vmem_need, 8 << 20), 48 << 20))

    out = pl.pallas_call(
        _conv3x3_kernel,
        out_shape=jax.ShapeDtypeStruct((B, Hp * W, Cout), x_nchw.dtype),
        grid=(B, nrt),
        in_specs=[
            # row-tiled im2col input (same tiling as the output, no halo)
            pl.BlockSpec((1, m, K), lambda bb, i: (bb, i, 0)),
            # weights / bias: constant index_map -> resident in VMEM
            pl.BlockSpec((K, Cout), lambda bb, i: (0, 0)),
            pl.BlockSpec((1, Cout), lambda bb, i: (0, 0)),
        ],
        out_specs=pl.BlockSpec((1, m, Cout), lambda bb, i: (bb, i, 0)),
        compiler_params=pltpu.CompilerParams(
            dimension_semantics=("parallel", "parallel"),
            vmem_limit_bytes=vmem_limit),
    )(x_flat, w_mat, b_row)

    out = out.reshape(B, Hp, W, Cout)
    return out[:, :H] if Hp != H else out


# --------------------------------------------------------------------------
# Pure-JAX reference (lax conv) for verification
# --------------------------------------------------------------------------
def reference_forward(x_nchw, w_hwio, b):
    y = lax.conv_general_dilated(
        x_nchw.astype(jnp.float32), w_hwio.astype(jnp.float32),
        window_strides=(1, 1), padding="SAME",
        dimension_numbers=("NCHW", "HWIO", "NCHW"),
        precision=lax.Precision.HIGHEST)
    return jnp.transpose(y, (0, 2, 3, 1)) + b[None, None, None, :]


if __name__ == "__main__":
    B, Cin, H, W = 2, 3, 16, 16
    Cout = 128          # ConvTokenizer default embed_dim (lane-perfect)

    key = jax.random.PRNGKey(0)
    kx, kw, kb = jax.random.split(key, 3)
    x = jax.random.normal(kx, (B, Cin, H, W), jnp.float32)
    w = jax.random.normal(kw, (3, 3, Cin, Cout), jnp.float32) * 0.1
    b = jax.random.normal(kb, (Cout,), jnp.float32) * 0.1

    out = jax.block_until_ready(conv_tokenizer_forward(x, w, b))
    ref = reference_forward(x, w, b)

    assert out.shape == (B, H, W, Cout), out.shape
    max_err = float(jnp.max(jnp.abs(out - ref)))
    mean_err = float(jnp.mean(jnp.abs(out - ref)))
    # bf16 single-pass MXU inputs (27-term dots): expect ~1e-3 abs error
    assert max_err < 5e-2 and mean_err < 5e-3, (max_err, mean_err)

    print("KERNEL_OK")
</pallas_src>

<mosaic_0001>
module attributes {stable_mosaic.version = 11 : i64} {
  func.func @_conv3x3_kernel(%arg0: i32, %arg1: i32, %arg2: memref<1x256x27xbf16, #tpu.memory_space<vmem>>, %arg3: memref<27x128xbf16, #tpu.memory_space<vmem>>, %arg4: memref<1x128xf32, #tpu.memory_space<vmem>>, %arg5: memref<1x256x128xf32, #tpu.memory_space<vmem>>) attributes {dimension_semantics = [#tpu.dimension_semantics<parallel>, #tpu.dimension_semantics<parallel>], iteration_bounds = array<i64: 2, 1>, scalar_prefetch = 0 : i64, scratch_operands = 0 : i64, tpu.core_type = #tpu.core_type<tc>, window_params = [{transform_indices = @transform_0, window_bounds = array<i64: 1, 256, 27>}, {pipeline_mode = #tpu.pipeline_mode<synchronous>, transform_indices = @transform_1, window_bounds = array<i64: 27, 128>}, {pipeline_mode = #tpu.pipeline_mode<synchronous>, transform_indices = @transform_2, window_bounds = array<i64: 1, 128>}, {transform_indices = @transform_3, window_bounds = array<i64: 1, 256, 128>}]} {
    %c0 = arith.constant 0 : index
    %c0_0 = arith.constant 0 : index
    %c0_1 = arith.constant 0 : index
    %0 = vector.load %arg2[%c0, %c0_0, %c0_1] : memref<1x256x27xbf16, #tpu.memory_space<vmem>>, vector<1x256x27xbf16>
    %1 = vector.shape_cast %0 : vector<1x256x27xbf16> to vector<256x27xbf16>
    %c0_2 = arith.constant 0 : index
    %c0_3 = arith.constant 0 : index
    %2 = vector.load %arg3[%c0_2, %c0_3] : memref<27x128xbf16, #tpu.memory_space<vmem>>, vector<27x128xbf16>
    %cst = arith.constant dense<0.000000e+00> : vector<256x128xf32>
    %3 = tpu.matmul %1, %2, %cst {dimension_numbers = #tpu.dot_dimension_numbers<[1], [0], [0], [1], [0, 0, 1, 1], [], []>} : vector<256x27xbf16>, vector<27x128xbf16>, vector<256x128xf32> -> vector<256x128xf32>
    %c0_4 = arith.constant 0 : index
    %c0_5 = arith.constant 0 : index
    %4 = vector.load %arg4[%c0_4, %c0_5] : memref<1x128xf32, #tpu.memory_space<vmem>>, vector<1x128xf32>
    %5 = vector.broadcast %4 : vector<1x128xf32> to vector<256x128xf32>
    %6 = arith.addf %3, %5 : vector<256x128xf32>
    %c0_6 = arith.constant 0 : index
    %c0_7 = arith.constant 0 : index
    %c0_8 = arith.constant 0 : index
    %7 = vector.load %arg5[%c0_6, %c0_7, %c0_8] : memref<1x256x128xf32, #tpu.memory_space<vmem>>, vector<1x256x128xf32>
    %8 = vector.shape_cast %7 : vector<1x256x128xf32> to vector<256x128xf32>
    %9 = vector.shape_cast %6 : vector<256x128xf32> to vector<1x256x128xf32>
    tpu.vector_store %arg5[%c0_6, %c0_7, %c0_8], %9 {strides = array<i32>} : memref<1x256x128xf32, #tpu.memory_space<vmem>>, vector<1x256x128xf32>,
    return
  }
  func.func @transform_0(%arg0: i32, %arg1: i32) -> (i32, i32, i32) {
    %c0_i32 = arith.constant 0 : i32
    %c0_i32_0 = arith.constant 0 : i32
    return %arg0, %arg1, %c0_i32 : i32, i32, i32
  }
  func.func @transform_1(%arg0: i32, %arg1: i32) -> (i32, i32) {
    %c0_i32 = arith.constant 0 : i32
    %c0_i32_0 = arith.constant 0 : i32
    %c0_i32_1 = arith.constant 0 : i32
    return %c0_i32, %c0_i32_0 : i32, i32
  }
  func.func @transform_2(%arg0: i32, %arg1: i32) -> (i32, i32) {
    %c0_i32 = arith.constant 0 : i32
    %c0_i32_0 = arith.constant 0 : i32
    %c0_i32_1 = arith.constant 0 : i32
    return %c0_i32, %c0_i32_0 : i32, i32
  }
  func.func @transform_3(%arg0: i32, %arg1: i32) -> (i32, i32, i32) {
    %c0_i32 = arith.constant 0 : i32
    %c0_i32_0 = arith.constant 0 : i32
    return %arg0, %arg1, %c0_i32 : i32, i32, i32
  }
}

</mosaic_0001>

<bundles_post_ra>
// kernel: tpu_custom_call.1
= control target key start
LH: loop header
LB: loop body
LE: loop exit
PB: predicated region body
PF: predicated region fallthrough
CT: control target
= control target key end

     0   :  { %8 = vsyncpa [#allocation3], 0  ;;  %s1198_s0 = inlined_call_operand.vmem [shape: bf16[2,256,27], index: 0, kind: input, shape index: {}]   ;;  %s1199_s1 = inlined_call_operand.vmem [shape: bf16[27,128], index: 1, kind: input, shape index: {}]   ;;  %s1200_s2 = inlined_call_operand.vmem [shape: f32[1,128], index: 2, kind: input, shape index: {}]   ;;  %s1201_s3 = inlined_call_operand.hbm [shape: f32[2,256,128], index: 3, kind: output, shape index: {}]  }
   0x1   :  { %10 = vsyncpa [#allocation3 + $0x1], 0  ;;  %s967_s12 = smov 0   ;;  %s969_s13 = smov 0  }
   0x2   :  { %s971_s14 = smov 0   ;;  %s973_s15 = smov 0  }
   0x3   :  { %s975_s16 = smov 0   ;;  %s977_s17 = smov 0  }
   0x4 LB: > { %s679_s18 = sadd.s32 4294967295, %s941_s17   ;;  %s680_s19 = sadd.s32 4294967294, %s941_s17   ;;  %s941_s17 = sphi %s977_s17, %s16_s17   ;;  %s937_s16 = sphi %s975_s16, %s1208_s16   ;;  %s933_s15 = sphi %s973_s15, %s1207_s15   ;;  %s929_s14 = sphi %s971_s14, %s1206_s14   ;;  %s925_s13 = sphi %s969_s13, %s1205_s13   ;;  %s921_s12 = sphi %s967_s12, %s1204_s12  }
   0x5   : > { %s28_s20 = sadd.s32 1, %s937_s16  ;;  %s107_s21 = sadd.s32 1, %s929_s14 }
   0x6   : > { %p30_p0 = scmp.ge.s32.totalorder %s28_s20, 2  ;;  %p117_p1 = scmp.ne.s32.totalorder %s929_s14, %s925_s13 }
   0x7   : > { %p118_p2 = scmp.eq.s32.totalorder %s679_s18, 1  ;;  %p123_p3 = scmp.ne.s32.totalorder %s925_s13, %s921_s12 }
   0x8   : > { %s1210_s20 = smov (%p30_p0, %s28_s20), 0  ;;  %p124_p5 = scmp.eq.s32.totalorder %s680_s19, 1 }
   0x9   : > { %p1007_p4 = por %p118_p2, %p117_p1  ;;  %s102_s23 = ssub.s32 %s937_s16, %s1210_s20 }
   0xa   : > { %p683_p6 = scmp.ge.s32.totalorder %s941_s17, 1  ;;  %p105_p7 = scmp.eq.s32.totalorder %s102_s23, 0 }
   0xb   : > { %p1014_p8 = por %p124_p5, %p123_p3  ;;  %p161_p9 = scmp.lt.s32.totalorder %s941_s17, 3 }
   0xc   : > { %s1020_s25 = scalar_select %p105_p7, %s929_s14, %s107_s21  }
   0xd   : > { %p162_p10 = pnand %p683_p6, %p161_p9 }
   0xe   : > { %v845_v0 = vld [vmem:[%s1199_s1] sm:$0xff] (!%p162_p10)   ;;  %vm384_vm0 = vcmask (!%p162_p10), 1044480   ;;  %v846_v1 = vld [vmem:[%s1199_s1 + $0x8] sm:$0x3f] (!%p162_p10)   ;;  %vm385_vm1 = vcmask (!%p162_p10), 1045504   ;;  %p190_p11 = scmp.lt.s32.totalorder (!%p162_p10), %s933_s15, 1 }
   0xf   : > { %165 = sbr.rel (%p162_p10) target bundleno = 285 (0x11d), region = 32  ;;  %747 = vmatprep.subr.bf16.mxu0 (!%p162_p10), %v845_v0  ;;  %783 = vmatprep.subr.bf16.mxu1 (!%p162_p10), %v845_v0  ;;  %v943_v2 = vmov (!%p162_p10), 65535   ;;  %vm335_vm2 = vcmask (!%p162_p10), 220160   ;;  %s186_s8 = sand.u32 (!%p162_p10), 1, %s925_s13   ;;  %v1073_v22 = vld [vmem:[%s1200_s2] ss:$0 sm:$0xff] (!%p162_p10) }
  0x10   : > { %748 = vmatpush3.bf16.msra.mxu0 (!%p162_p10), %v845_v0  ;;  %785 = vmatpush3.bf16.msra.mxu1 (!%p162_p10), %v845_v0  ;;  %v386_v3 = vsel (!%p162_p10), %vm384_vm0, 4294967295, %v943_v2  ;;  %s684_s9 = sshll.u32 (!%p162_p10), %s186_s8, 8  ;;  %s728_s19 = sshll.u32 (!%p162_p10), %s933_s15, 12 }
  0x11   : > { %v387_v4 = vsel (!%p162_p10), %vm385_vm1, %v386_v3, 0  ;;  %s1078_s18 = scalar_lea.vmem (!%p162_p10), [#allocation2], %s684_s9  ;;  %s1140_s26 = scalar_lea.hbm (!%p162_p10), %s1201_s3, %s728_s19 }
  0x12   : > { %v389_v5 = vand.u32 (!%p162_p10), %v846_v1, %v387_v4  ;;  %s600_s21 = sshll.u32 (!%p162_p10), %s1078_s18, 4  ;;  %s1152_s27 = scalar_lea.sflag (!%p162_p10), [#allocation3], %s186_s8  ;;  %s1142_s21 = int_to_ptr.vmem [resolvable:$true] %s600_s21 }
  0x13   : > { %s863_s28 = scalar_lea.vmem (!%p162_p10), %s1142_s21, 4096  ;;  %s944_s29 = smov (!%p162_p10), [#allocation2]  }
  0x14   : > { %749 = vmatprep.subr.bf16.mxu0 (!%p162_p10), %v389_v5  ;;  %784 = vmatprep.subr.bf16.mxu1 (!%p162_p10), %v389_v5  ;;  %p864_p12 = scmp.ne.s32.totalorder (!%p162_p10), %s1142_s21, %s863_s28 }
  0x15   : > { %750 = vmatpush3.bf16.msra.mxu0 (!%p162_p10), %v389_v5  ;;  %786 = vmatpush3.bf16.msra.mxu1 (!%p162_p10), %v389_v5 }
  0x16   : > { %s191_s30 = scalar_select %p190_p11, %s933_s15, 1 }
  0x17   : > { %p865_p13 = pnand %p864_p12, %p1007_p4 }
  0x18   : > { %s727_s4 = sshll.u32 %s191_s30, 7  ;;  %s867_s30 = sshll.u32 %s944_s29, 4  ;;  %s868_s30 = int_to_ptr.vmem [resolvable:$false] %s867_s30 }
  0x19   : > { %s1033_s7 = scalar_lea.vmem %s1198_s0, %s727_s4  ;;  %p866_p0 = pneg %p865_p13 }
  0x1a   : > { %v847_v6 = vld [vmem:[%s1033_s7] sm:$0xff]   ;;  %v849_v8 = vld [vmem:[%s1033_s7 + $0x8] sm:$0xff]   ;;  %v851_v10 = vld [vmem:[%s1033_s7 + $0x10] sm:$0xff]   ;;  %s869_s4 = scalar_lea.vmem %s868_s30, 8192  ;;  %p870_p1 = scmp.lt.s32.totalorder %s1142_s21, %s868_s30 }
  0x1b   : > { %v848_v7 = vld [vmem:[%s1033_s7 + $0x40] sm:$0xff]   ;;  %751 = vmatprep.mubr.msk.bf16.mxu0 %vm335_vm2, %v847_v6  ;;  %v850_v9 = vld [vmem:[%s1033_s7 + $0x48] sm:$0xff]   ;;  %v852_v11 = vld [vmem:[%s1033_s7 + $0x50] sm:$0xff]   ;;  %p871_p2 = scmp.lt.s32.totalorder %s869_s4, %s863_s28 }
  0x1c   : > { %767 = vmatprep.mubr.msk.bf16.mxu1 %vm335_vm2, %v848_v7  ;;  %752 = vmatmul.mubr.msk.bf16.vlgmr.msra.gmra.mrb[0].mxu0 %vm335_vm2, %v849_v8  ;;  %v853_v12 = vld [vmem:[%s1033_s7 + $0x18] sm:$0xff]   ;;  %v855_v14 = vld [vmem:[%s1033_s7 + $0x20] sm:$0xff]   ;;  %v857_v16 = vld [vmem:[%s1033_s7 + $0x28] sm:$0xff]  }
  0x1d   : > { %768 = vmatmul.mubr.msk.bf16.vlgmr.msra.gmra.mrb[0].mxu1 %vm335_vm2, %v850_v9  ;;  %755 = vmatprep.mubr.msk.bf16.mxu0 %vm335_vm2, %v851_v10  ;;  %v854_v13 = vld [vmem:[%s1033_s7 + $0x58] sm:$0xff]   ;;  %v856_v15 = vld [vmem:[%s1033_s7 + $0x60] sm:$0xff]   ;;  %v858_v17 = vld [vmem:[%s1033_s7 + $0x68] sm:$0xff]   ;;  %p872_p3 = por %p871_p2, %p870_p1 }
  0x1e   : > { %771 = vmatprep.mubr.msk.bf16.mxu1 %vm335_vm2, %v852_v11  ;;  %v859_v18 = vld [vmem:[%s1033_s7 + $0x30] sm:$0xff]   ;;  %v861_v20 = vld [vmem:[%s1033_s7 + $0x38] sm:$0xff]  }
  0x1f   : > { %v860_v19 = vld [vmem:[%s1033_s7 + $0x70] sm:$0xff]   ;;  %v862_v21 = vld [vmem:[%s1033_s7 + $0x78] sm:$0xff]   ;;  %p873_p5 = pnand %p872_p3, %p866_p0 }
  0x24   : > { %756 = vmatmul.mubr.msk.bf16.gmra.mrb[4].mxu0 %vm335_vm2, %v853_v12 }
  0x25   : > { %772 = vmatmul.mubr.msk.bf16.gmra.mrb[4].mxu1 %vm335_vm2, %v854_v13  ;;  %759 = vmatprep.mubr.msk.bf16.mxu0 %vm335_vm2, %v855_v14 }
  0x26   : > { %775 = vmatprep.mubr.msk.bf16.mxu1 %vm335_vm2, %v856_v15 }
  0x2c   : > { %760 = vmatmul.mubr.msk.bf16.gmra.mrb[8].mxu0 %vm335_vm2, %v857_v16 }
  0x2d   : > { %776 = vmatmul.mubr.msk.bf16.gmra.mrb[8].mxu1 %vm335_vm2, %v858_v17  ;;  %763 = vmatprep.mubr.msk.bf16.mxu0 %vm335_vm2, %v859_v18 }
  0x2e   : > { %779 = vmatprep.mubr.msk.bf16.mxu1 %vm335_vm2, %v860_v19 }
  0x34   : > { %764 = vmatmul.mubr.msk.bf16.gmra.mrb[12].mxu0 %vm335_vm2, %v861_v20 }
  0x35   : > { %780 = vmatmul.mubr.msk.bf16.gmra.mrb[12].mxu1 %vm335_vm2, %v862_v21 }
  0xef   : > { %v753_v23 = vpop.f32.mrb[0].mxu0 }
  0xf0   : > { %v434_v24 = vadd.f32 %v753_v23, %v1073_v22  ;;  %v769_v25 = vpop.f32.mrb[0].mxu1  ;;  %v425_v26 = vpop.f32.mrb[1].mxu0 }
  0xf1   : > { %v498_v27 = vadd.f32 %v769_v25, %v1073_v22  ;;  %v426_v28 = vadd.f32 %v1073_v22, %v425_v26  ;;  %v489_v29 = vpop.f32.mrb[1].mxu1  ;;  %v754_v30 = vpop.f32.mrb[2].mxu0 }
  0xf2   : > { %554 = vst [vmem:[%s1078_s18 + $0x10] sm:$0xff] %v434_v24  ;;  %v490_v31 = vadd.f32 %v1073_v22, %v489_v29  ;;  %v437_v32 = vadd.f32 %v754_v30, %v1073_v22  ;;  %v770_v33 = vpop.f32.mrb[2].mxu1  ;;  %v428_v34 = vpop.f32.mrb[3].mxu0 }
  0xf3   : > { %570 = vst [vmem:[%s1078_s18 + $0x90] sm:$0xff] %v498_v27  ;;  %552 = vst [vmem:[%s1078_s18] sm:$0xff] %v426_v28  ;;  %v501_v35 = vadd.f32 %v770_v33, %v1073_v22  ;;  %v429_v36 = vadd.f32 %v1073_v22, %v428_v34  ;;  %v492_v37 = vpop.f32.mrb[3].mxu1 }
  0xf4   : > { %568 = vst [vmem:[%s1078_s18 + $0x80] sm:$0xff] %v490_v31  ;;  %555 = vst [vmem:[%s1078_s18 + $0x18] sm:$0xff] %v437_v32  ;;  %v493_v38 = vadd.f32 %v1073_v22, %v492_v37 }
  0xf5   : > { %571 = vst [vmem:[%s1078_s18 + $0x98] sm:$0xff] %v501_v35  ;;  %553 = vst [vmem:[%s1078_s18 + $0x8] sm:$0xff] %v429_v36 }
  0xf6   : > { %569 = vst [vmem:[%s1078_s18 + $0x88] sm:$0xff] %v493_v38 }
  0xf7   : > { %v757_v39 = vpop.f32.mrb[4].mxu0 }
  0xf8   : > { %v450_v40 = vadd.f32 %v757_v39, %v1073_v22  ;;  %v773_v41 = vpop.f32.mrb[4].mxu1  ;;  %v441_v42 = vpop.f32.mrb[5].mxu0 }
  0xf9   : > { %v514_v43 = vadd.f32 %v773_v41, %v1073_v22  ;;  %v442_v44 = vadd.f32 %v1073_v22, %v441_v42  ;;  %v505_v45 = vpop.f32.mrb[5].mxu1  ;;  %v758_v46 = vpop.f32.mrb[6].mxu0 }
  0xfa   : > { %558 = vst [vmem:[%s1078_s18 + $0x30] sm:$0xff] %v450_v40  ;;  %v506_v47 = vadd.f32 %v1073_v22, %v505_v45  ;;  %v453_v48 = vadd.f32 %v758_v46, %v1073_v22  ;;  %v774_v49 = vpop.f32.mrb[6].mxu1  ;;  %v444_v50 = vpop.f32.mrb[7].mxu0 }
  0xfb   : > { %574 = vst [vmem:[%s1078_s18 + $0xb0] sm:$0xff] %v514_v43  ;;  %556 = vst [vmem:[%s1078_s18 + $0x20] sm:$0xff] %v442_v44  ;;  %v517_v51 = vadd.f32 %v774_v49, %v1073_v22  ;;  %v445_v52 = vadd.f32 %v1073_v22, %v444_v50  ;;  %v508_v53 = vpop.f32.mrb[7].mxu1 }
  0xfc   : > { %572 = vst [vmem:[%s1078_s18 + $0xa0] sm:$0xff] %v506_v47  ;;  %559 = vst [vmem:[%s1078_s18 + $0x38] sm:$0xff] %v453_v48  ;;  %v509_v54 = vadd.f32 %v1073_v22, %v508_v53 }
  0xfd   : > { %575 = vst [vmem:[%s1078_s18 + $0xb8] sm:$0xff] %v517_v51  ;;  %557 = vst [vmem:[%s1078_s18 + $0x28] sm:$0xff] %v445_v52 }
  0xfe   : > { %573 = vst [vmem:[%s1078_s18 + $0xa8] sm:$0xff] %v509_v54 }
  0xff   : > { %v761_v55 = vpop.f32.mrb[8].mxu0 }
 0x100   : > { %v466_v56 = vadd.f32 %v761_v55, %v1073_v22  ;;  %v777_v57 = vpop.f32.mrb[8].mxu1  ;;  %v457_v58 = vpop.f32.mrb[9].mxu0 }
 0x101   : > { %v530_v59 = vadd.f32 %v777_v57, %v1073_v22  ;;  %v458_v60 = vadd.f32 %v1073_v22, %v457_v58  ;;  %v521_v61 = vpop.f32.mrb[9].mxu1  ;;  %v762_v62 = vpop.f32.mrb[10].mxu0 }
 0x102   : > { %562 = vst [vmem:[%s1078_s18 + $0x50] sm:$0xff] %v466_v56  ;;  %v522_v63 = vadd.f32 %v1073_v22, %v521_v61  ;;  %v469_v0 = vadd.f32 %v762_v62, %v1073_v22  ;;  %v778_v1 = vpop.f32.mrb[10].mxu1  ;;  %v460_v2 = vpop.f32.mrb[11].mxu0 }
 0x103   : > { %578 = vst [vmem:[%s1078_s18 + $0xd0] sm:$0xff] %v530_v59  ;;  %560 = vst [vmem:[%s1078_s18 + $0x40] sm:$0xff] %v458_v60  ;;  %v533_v3 = vadd.f32 %v778_v1, %v1073_v22  ;;  %v461_v4 = vadd.f32 %v1073_v22, %v460_v2  ;;  %v524_v5 = vpop.f32.mrb[11].mxu1 }
 0x104   : > { %576 = vst [vmem:[%s1078_s18 + $0xc0] sm:$0xff] %v522_v63  ;;  %563 = vst [vmem:[%s1078_s18 + $0x58] sm:$0xff] %v469_v0  ;;  %v525_v6 = vadd.f32 %v1073_v22, %v524_v5 }
 0x105   : > { %579 = vst [vmem:[%s1078_s18 + $0xd8] sm:$0xff] %v533_v3  ;;  %561 = vst [vmem:[%s1078_s18 + $0x48] sm:$0xff] %v461_v4 }
 0x106   : > { %577 = vst [vmem:[%s1078_s18 + $0xc8] sm:$0xff] %v525_v6 }
 0x107   : > { %v765_v7 = vpop.f32.mrb[12].mxu0 }
 0x108   : > { %v482_v8 = vadd.f32 %v765_v7, %v1073_v22  ;;  %v781_v9 = vpop.f32.mrb[12].mxu1  ;;  %v473_v10 = vpop.f32.mrb[13].mxu0 }
 0x109   : > { %v546_v11 = vadd.f32 %v781_v9, %v1073_v22  ;;  %v474_v12 = vadd.f32 %v1073_v22, %v473_v10  ;;  %v537_v13 = vpop.f32.mrb[13].mxu1  ;;  %v766_v14 = vpop.f32.mrb[14].mxu0 }
 0x10a   : > { %566 = vst [vmem:[%s1078_s18 + $0x70] sm:$0xff] %v482_v8  ;;  %v538_v15 = vadd.f32 %v1073_v22, %v537_v13  ;;  %v485_v16 = vadd.f32 %v766_v14, %v1073_v22  ;;  %v782_v17 = vpop.f32.mrb[14].mxu1  ;;  %v476_v18 = vpop.f32.mrb[15].mxu0 }
 0x10b   : > { %582 = vst [vmem:[%s1078_s18 + $0xf0] sm:$0xff] %v546_v11  ;;  %564 = vst [vmem:[%s1078_s18 + $0x60] sm:$0xff] %v474_v12  ;;  %v549_v19 = vadd.f32 %v782_v17, %v1073_v22  ;;  %v477_v20 = vadd.f32 %v1073_v22, %v476_v18  ;;  %v540_v21 = vpop.f32.mrb[15].mxu1 }
 0x10c   : > { %580 = vst [vmem:[%s1078_s18 + $0xe0] sm:$0xff] %v538_v15  ;;  %567 = vst [vmem:[%s1078_s18 + $0x78] sm:$0xff] %v485_v16  ;;  %v541_v23 = vadd.f32 %v1073_v22, %v540_v21 }
 0x10d   : > { %583 = vst [vmem:[%s1078_s18 + $0xf8] sm:$0xff] %v549_v19  ;;  %565 = vst [vmem:[%s1078_s18 + $0x68] sm:$0xff] %v477_v20 }
 0x10e   : > { %581 = vst [vmem:[%s1078_s18 + $0xe8] sm:$0xff] %v541_v23 }
 0x10f   : > { %876 = shalt.err (!%p873_p5)
}
 0x110   : > { %s877_s5 = scalar_lea.hbm %s1140_s26, 4096  ;;  %s881_s8 = scalar_lea.hbm %s1201_s3, 8192 }
 0x111   : > { %p878_p6 = scmp.ne.s32.totalorder %s1140_s26, %s877_s5  ;;  %p882_p10 = scmp.lt.u32.totalorder %s1140_s26, %s1201_s3 }
 0x112   : > { %p883_p11 = scmp.lt.u32.totalorder %s881_s8, %s877_s5  ;;  %p885_p13 = scmp.lt.u32.totalorder %s877_s5, %s1140_s26 }
 0x113   : > { %p879_p7 = pnand %p878_p6, %p1007_p4 }
 0x114   : > { %p884_p12 = por %p883_p11, %p882_p10 }
 0x115   : > { %p880_p9 = pneg %p879_p7 }
 0x116   : > { %p886_p0 = por %p885_p13, %p884_p12 }
 0x118   : > { %p887_p1 = pnand %p886_p0, %p880_p9 }
 0x11a   : > { %890 = shalt.err (!%p887_p1)
}
 0x11b   : > { %s945_s11 = smov 128   ;;  %s946_s18 = smov 8  }
 0x11c   : > { %787 = dma.vmem_to_hbm [thread:$0]  (%p1007_p4), %s1142_s21, 4096, %s1140_s26, %s1152_s27, %s945_s11, %s945_s11, %s946_s18  }
 0x11d PF: > { %p793_p2 = scmp.ge.s32.totalorder %s941_s17, 2  ;;  %s615_s19 = sand.u32 1, %s921_s12  }
 0x11e   : > { %s616_s15 = scalar_lea.sflag [#allocation3], %s615_s19 }
 0x11f   : > { %p790_p3 = pnand %p793_p2, %p1014_p8 }
 0x121   : > { %916 = dma.done.wait (!%p790_p3), %s616_s15, 4096  }
 0x122   : > { %918 = vsyncadd (!%p790_p3), %s616_s15, 4294963200  ;;  %s16_s17 = sadd.s32 1, %s941_s17   ;;  %s1204_s12 = smov %s925_s13 }
 0x123   : > { %p13_p5 = scmp.ge.s32.totalorder %s16_s17, 4   ;;  %s1205_s13 = smov %s929_s14 }
 0x124   : > { %s1206_s14 = smov %s1020_s25  ;;  %s1207_s15 = smov %s937_s16 }
 0x125   : > { %s1208_s16 = smov %s1210_s20  ;;  %15 = sbr.rel (!%p13_p5) target bundleno = 4 (0x4), region = 67 }
 0x12c   :  { %621 = vsyncpa [#allocation3], 1 }
 0x12d   :  { %623 = vsyncpa [#allocation3 + $0x1], 1 }

</bundles_post_ra>
